<compile_context>
chip_gen: v6e
topology: v6e:2x2x1
jax: 0.10.0
libtpu: 0.0.40
codegen_flags: <defaults>
</compile_context>

<pallas_src>
import jax
import jax.numpy as jnp
from jax.experimental import pallas as pl
from jax.experimental.pallas import tpu as pltpu

BN_EPS = 1e-5
MXU_DTYPE = jnp.bfloat16        # MXU input dtype; accumulation / BN math stay f32
LANE = 128                      # lane width: min MXU-friendly feature multiple
SUBLANE_BF16 = 16               # bf16 sublane packing for the dot LHS (batch axis)
DEFAULT_STREAM_TILE_N = 256     # weight-streaming tile (v6e/v7x MXU); falls back to 128


def _round_up(x, m):
    return ((x + m - 1) // m) * m


def _vmem_capacity_bytes():
    """Generation-aware VMEM capacity (v5e/v6e: 128 MiB, v7x: 64 MiB per TC)."""
    try:
        return int(pltpu.get_tpu_info().vmem_capacity_bytes)
    except Exception:
        return 64 << 20         # conservative fallback (v7x per-TensorCore VMEM)


def _linear_bn_relu(h_bf16, w_bf16, gamma, beta, inv_n, row_mask):
    """Linear (no bias) -> train-mode BatchNorm1d (one-pass stats) -> ReLU. f32 result."""
    y = jnp.dot(h_bf16, w_bf16, preferred_element_type=jnp.float32)      # MXU, f32 acc
    # One-pass stats: E[y] and E[y^2] in the same sweep (halves XLU reductions).
    mean = jnp.sum(y, axis=0, keepdims=True) * inv_n
    ex2 = jnp.sum(y * y, axis=0, keepdims=True) * inv_n
    var = jnp.maximum(ex2 - mean * mean, 0.0)          # clamp: guard rsqrt vs rounding
    scale = gamma * jax.lax.rsqrt(var + BN_EPS)         # rsqrt -> EUP slot
    shift = beta - scale * mean
    act = jnp.maximum(scale * y + shift, 0.0)           # ReLU (Dropout p=0 == identity)
    if row_mask is not None:
        act = jnp.where(row_mask, act, 0.0)              # keep zero-padded batch rows 0
    return act


# ----------------------------------------------------------------------------- kernels
def _make_resident_kernel(meta):
    """All weights resident in VMEM; whole MLP fused in one program."""
    nh, has_out = meta["num_hidden"], meta["has_output"]
    n_real, n_pad = meta["n_real"], meta["n_pad"]
    out_pads, col_off = meta["out_pads"], meta["col_off"]
    inv_n = 1.0 / float(n_real)

    def kernel(*refs):
        i = 0
        x_ref = refs[i]; i += 1
        w_refs = refs[i:i + nh]; i += nh
        gb_ref = None
        if nh > 0:
            gb_ref = refs[i]; i += 1
        if has_out:
            wo_ref, bo_ref = refs[i], refs[i + 1]; i += 2
        o_ref = refs[i]

        row_mask = None
        if n_pad > n_real:
            row_mask = jax.lax.broadcasted_iota(jnp.int32, (n_pad, 1), 0) < n_real

        h = x_ref[...]                                   # bf16 activations between layers
        act_f32 = None
        for l in range(nh):
            off, npad = col_off[l], out_pads[l]
            gamma = gb_ref[0:1, off:off + npad]
            beta = gb_ref[1:2, off:off + npad]
            act_f32 = _linear_bn_relu(h, w_refs[l][...], gamma, beta, inv_n, row_mask)
            h = act_f32.astype(MXU_DTYPE)                # carry in bf16

        if has_out:
            # Linear(in, 1) as a lane reduction (VPU mul + XLU reduce); out_dim == 1.
            o = (jnp.sum(h.astype(jnp.float32) * wo_ref[...], axis=1, keepdims=True)
                 + bo_ref[0, 0])
            o_ref[...] = o.astype(o_ref.dtype)
        else:
            o_ref[...] = act_f32.astype(o_ref.dtype)

    return kernel


def _make_streamed_kernel(meta):
    """Hidden weights in HBM; stream lane-aligned N-tiles with a 2-deep double buffer."""
    nh, has_out = meta["num_hidden"], meta["has_output"]
    n_real, n_pad = meta["n_real"], meta["n_pad"]
    in_pads, out_pads = meta["in_pads"], meta["out_pads"]
    tiles, col_off = meta["tiles"], meta["col_off"]
    inv_n = 1.0 / float(n_real)

    def kernel(*refs):
        i = 0
        x_ref = refs[i]; i += 1
        w_hbm = refs[i:i + nh]; i += nh
        gb_ref = refs[i]; i += 1
        if has_out:
            wo_ref, bo_ref = refs[i], refs[i + 1]; i += 2
        o_ref = refs[i]; i += 1
        slab_a, slab_b, wbuf, sem = refs[i:i + 4]
        slabs = (slab_a, slab_b)

        row_mask = None
        if n_pad > n_real:
            row_mask = jax.lax.broadcasted_iota(jnp.int32, (n_pad, 1), 0) < n_real

        for l in range(nh):
            K, N, tile, off = in_pads[l], out_pads[l], tiles[l], col_off[l]
            ntiles = N // tile
            w_ref = w_hbm[l]
            dst_is_out = (l == nh - 1) and not has_out
            dst = o_ref if dst_is_out else slabs[l % 2]
            src = x_ref if l == 0 else slabs[(l - 1) % 2]

            def fetch(t, slot, w_ref=w_ref, K=K, tile=tile):
                pltpu.make_async_copy(
                    w_ref.at[pl.ds(0, K), pl.ds(t * tile, tile)],
                    wbuf.at[slot, 0:K, 0:tile],
                    sem.at[slot]).start()

            fetch(0, 0)                                  # prime slot 0 (overlaps h load)
            h_bf = src[:, 0:K]                           # bf16 (n_pad, K)
            for t in range(ntiles):                      # static trip count
                slot = t % 2
                pltpu.make_async_copy(
                    w_ref.at[pl.ds(0, K), pl.ds(t * tile, tile)],
                    wbuf.at[slot, 0:K, 0:tile],
                    sem.at[slot]).wait()
                if t + 1 < ntiles:
                    fetch(t + 1, 1 - slot)               # overlap next tile's DMA
                gamma = gb_ref[0:1, off + t * tile: off + (t + 1) * tile]
                beta = gb_ref[1:2, off + t * tile: off + (t + 1) * tile]
                act = _linear_bn_relu(h_bf, wbuf[slot, 0:K, 0:tile],
                                      gamma, beta, inv_n, row_mask)
                if dst_is_out:
                    dst[:, t * tile:(t + 1) * tile] = act
                else:
                    dst[:, t * tile:(t + 1) * tile] = act.astype(MXU_DTYPE)

        if has_out:
            h_last = slabs[(nh - 1) % 2][:, 0:out_pads[-1]]
            o = (jnp.sum(h_last.astype(jnp.float32) * wo_ref[...], axis=1, keepdims=True)
                 + bo_ref[0, 0])
            o_ref[...] = o.astype(o_ref.dtype)

    return kernel


# ----------------------------------------------------------------------------- wrapper
def _pack(params, x):
    """Pad to MXU/lane-aligned shapes, concat gamma/beta, build metadata."""
    n_real, in_dim = x.shape
    n_pad = _round_up(n_real, SUBLANE_BF16)
    k0_pad = _round_up(in_dim, LANE)
    x_pad = jnp.zeros((n_pad, k0_pad), MXU_DTYPE).at[:n_real, :in_dim].set(
        x.astype(MXU_DTYPE))

    w_pads, in_pads, out_pads, col_off = [], [], [], []
    gammas, betas = [], []
    k_prev, k_prev_pad, off = in_dim, k0_pad, 0
    for (w, _b, gamma, beta) in params["hidden"]:
        kin, nout = w.shape
        npad = _round_up(nout, LANE)
        wp = jnp.zeros((k_prev_pad, npad), MXU_DTYPE).at[:kin, :nout].set(
            w.astype(MXU_DTYPE))
        w_pads.append(wp)
        in_pads.append(k_prev_pad)
        out_pads.append(npad)
        col_off.append(off)
        # Padded features get gamma=beta=0 so they stay exactly 0 through BN/ReLU.
        gammas.append(jnp.zeros((npad,), jnp.float32).at[:nout].set(gamma))
        betas.append(jnp.zeros((npad,), jnp.float32).at[:nout].set(beta))
        off += npad
        k_prev, k_prev_pad = nout, npad

    gb = (jnp.stack([jnp.concatenate(gammas), jnp.concatenate(betas)], axis=0)
          if w_pads else None)

    wo_pad, b_out = None, None
    if params["out"] is not None:
        w_out, b = params["out"]                          # (1, last_dim), (1, 1)
        wo_pad = jnp.zeros((1, k_prev_pad), jnp.float32).at[:, :k_prev].set(
            w_out.astype(jnp.float32))
        b_out = jnp.asarray(b, jnp.float32).reshape(1, 1)

    tiles = []
    for npad in out_pads:
        t = DEFAULT_STREAM_TILE_N if npad % DEFAULT_STREAM_TILE_N == 0 else LANE
        tiles.append(min(t, npad))

    meta = dict(num_hidden=len(w_pads), has_output=params["out"] is not None,
                n_real=n_real, n_pad=n_pad, k0_pad=k0_pad,
                in_pads=in_pads, out_pads=out_pads, col_off=col_off, tiles=tiles,
                last_dim=k_prev, last_pad=k_prev_pad)
    return x_pad, w_pads, gb, wo_pad, b_out, meta


def mlp_forward(params, x, force_stream=False):
    """Run the MLP forward pass with Pallas (resident fused path or streamed path)."""
    num_hidden = len(params["hidden"])
    has_output = params["out"] is not None
    if num_hidden == 0 and not has_output:
        return x

    x_pad, w_pads, gb, wo_pad, b_out, meta = _pack(params, x)
    n_real, n_pad = meta["n_real"], meta["n_pad"]

    vmem_cap = _vmem_capacity_bytes()
    vmem_limit = int(vmem_cap * 7 // 8)                   # ~56 MiB on v7x, ~112 MiB on v6e
    cparams = pltpu.CompilerParams(vmem_limit_bytes=vmem_limit)

    out_cols = 1 if has_output else meta["last_pad"]
    out_shape = jax.ShapeDtypeStruct((n_pad, out_cols), jnp.float32)

    # Resident-path VMEM estimate: inputs (single-buffered; no grid) + f32 working set.
    resident_bytes = x_pad.size * x_pad.dtype.itemsize
    resident_bytes += sum(int(w.size) * w.dtype.itemsize for w in w_pads)
    if gb is not None:
        resident_bytes += int(gb.size) * 4
    if has_output:
        resident_bytes += int(wo_pad.size) * 4 + 4
    max_dim = max([meta["k0_pad"]] + meta["out_pads"])
    resident_bytes += 3 * n_pad * max_dim * 4 + n_pad * out_cols * 4
    use_stream = (force_stream or resident_bytes > int(vmem_cap * 3 // 4)) and num_hidden > 0

    vmem = pl.BlockSpec(memory_space=pltpu.MemorySpace.VMEM)
    smem = pl.BlockSpec(memory_space=pltpu.MemorySpace.SMEM)
    hbm = pl.BlockSpec(memory_space=pl.ANY)

    inputs = [x_pad] + list(w_pads)
    in_specs = [vmem] + [hbm if use_stream else vmem] * num_hidden
    if num_hidden > 0:
        inputs.append(gb); in_specs.append(vmem)
    if has_output:
        inputs += [wo_pad, b_out]; in_specs += [vmem, smem]

    if not use_stream:
        out = pl.pallas_call(
            _make_resident_kernel(meta),
            out_shape=out_shape,
            in_specs=in_specs,
            out_specs=vmem,
            compiler_params=cparams,
        )(*inputs)
    else:
        max_k = max(meta["in_pads"])
        max_tile = max(meta["tiles"])
        max_out = max(meta["out_pads"])
        scratch = [
            pltpu.VMEM((n_pad, max_out), MXU_DTYPE),          # activation slab A
            pltpu.VMEM((n_pad, max_out), MXU_DTYPE),          # activation slab B
            pltpu.VMEM((2, max_k, max_tile), MXU_DTYPE),      # weight double buffer
            pltpu.SemaphoreType.DMA((2,)),
        ]
        out = pl.pallas_call(
            _make_streamed_kernel(meta),
            out_shape=out_shape,
            in_specs=in_specs,
            out_specs=vmem,
            scratch_shapes=scratch,
            compiler_params=cparams,
        )(*inputs)

    if has_output:
        return out[:n_real, :]
    return out[:n_real, :meta["last_dim"]]


# ----------------------------------------------------------------------------- params / refs
def init_mlp_params(key, input_dim, dims, output_layer=True, weight_dtype=MXU_DTYPE):
    """Parameter init mimicking the torch module's shapes (weights pre-transposed)."""
    params = {"hidden": [], "out": None}
    in_dim = input_dim
    for i_dim in dims:
        key, kw, kb = jax.random.split(key, 3)
        bound = 1.0 / (in_dim ** 0.5)
        w = jax.random.uniform(kw, (in_dim, i_dim), jnp.float32, -bound, bound)
        w = w.astype(weight_dtype)                       # bf16 storage: halves weight DMA
        b = jax.random.uniform(kb, (i_dim,), jnp.float32, -bound, bound)  # cancelled by BN
        gamma = jnp.ones((i_dim,), jnp.float32)          # BatchNorm1d weight init
        beta = jnp.zeros((i_dim,), jnp.float32)          # BatchNorm1d bias init
        params["hidden"].append((w, b, gamma, beta))
        in_dim = i_dim
    if output_layer:
        key, kw, kb = jax.random.split(key, 3)
        bound = 1.0 / (in_dim ** 0.5)
        w = jax.random.uniform(kw, (1, in_dim), jnp.float32, -bound, bound)  # row vector
        b = jax.random.uniform(kb, (1,), jnp.float32, -bound, bound).reshape(1, 1)
        params["out"] = (w, b)
    return params


def mlp_forward_ref_f32(params, x):
    """Full-f32 pure-JAX reference matching torch train-mode forward (with biases)."""
    h = x
    for (w, b, gamma, beta) in params["hidden"]:
        y = h @ w.astype(jnp.float32) + b
        mean = jnp.mean(y, axis=0, keepdims=True)
        var = jnp.mean((y - mean) ** 2, axis=0, keepdims=True)
        y = gamma * (y - mean) * jax.lax.rsqrt(var + BN_EPS) + beta
        h = jnp.maximum(y, 0.0)
    if params["out"] is not None:
        w, b = params["out"]
        h = h @ w.astype(jnp.float32).T + b
    return h


def mlp_forward_ref_matched(params, x):
    """Pure-JAX reference mirroring the kernel numerics (bf16 MXU inputs, one-pass BN,
    bf16 inter-layer carry, no hidden bias, lane-reduction output head)."""
    n = x.shape[0]
    inv_n = 1.0 / float(n)
    h = x.astype(MXU_DTYPE)
    for (w, _b, gamma, beta) in params["hidden"]:
        y = jnp.dot(h, w.astype(MXU_DTYPE), preferred_element_type=jnp.float32)
        mean = jnp.sum(y, axis=0, keepdims=True) * inv_n
        ex2 = jnp.sum(y * y, axis=0, keepdims=True) * inv_n
        var = jnp.maximum(ex2 - mean * mean, 0.0)
        scale = gamma * jax.lax.rsqrt(var + BN_EPS)
        shift = beta - scale * mean
        h = jnp.maximum(scale * y + shift, 0.0).astype(MXU_DTYPE)
    if params["out"] is not None:
        w, b = params["out"]
        return jnp.sum(h.astype(jnp.float32) * w, axis=1, keepdims=True) + b
    return h.astype(jnp.float32)


if __name__ == "__main__":
    key = jax.random.PRNGKey(0)
    key, kx, kp = jax.random.split(key, 3)

    batch, input_dim = 8, 32
    dims = [64, 32]

    x = jax.random.normal(kx, (batch, input_dim), jnp.float32)
    params = init_mlp_params(kp, input_dim, dims, output_layer=True)

    # Path 1: fully fused, weights resident in VMEM (auto-selected at these sizes).
    out_resident = jax.block_until_ready(mlp_forward(params, x))
    # Path 2: weights streamed from HBM with a manual double buffer (forced, to exercise it).
    out_streamed = jax.block_until_ready(mlp_forward(params, x, force_stream=True))

    ref_matched = mlp_forward_ref_matched(params, x)   # same numerics as the kernels
    ref_f32 = mlp_forward_ref_f32(params, x)           # torch train-mode semantics in f32

    assert out_resident.shape == (batch, 1), out_resident.shape
    assert out_streamed.shape == (batch, 1), out_streamed.shape
    # Tight: validates fusion / padding / BN-fold / one-pass stats / epilogue logic.
    assert jnp.allclose(out_resident, ref_matched, atol=2e-3, rtol=2e-3), (out_resident, ref_matched)
    assert jnp.allclose(out_streamed, ref_matched, atol=2e-3, rtol=2e-3), (out_streamed, ref_matched)
    # Loose: bf16 MXU inputs vs. full-f32 torch-semantics reference.
    assert jnp.allclose(out_resident, ref_f32, atol=5e-2, rtol=5e-2), (out_resident, ref_f32)
    assert jnp.allclose(out_streamed, ref_f32, atol=5e-2, rtol=5e-2), (out_streamed, ref_f32)

    print("KERNEL_OK")
</pallas_src>

<mosaic_0001>
module attributes {stable_mosaic.version = 11 : i64} {
  func.func @kernel(%arg0: memref<16x128xbf16, #tpu.memory_space<vmem>>, %arg1: memref<128x128xbf16, #tpu.memory_space<vmem>>, %arg2: memref<128x128xbf16, #tpu.memory_space<vmem>>, %arg3: memref<2x256xf32, #tpu.memory_space<vmem>>, %arg4: memref<1x128xf32, #tpu.memory_space<vmem>>, %arg5: memref<1x1xf32, #tpu.memory_space<smem>>, %arg6: memref<16x1xf32, #tpu.memory_space<vmem>>) attributes {dimension_semantics = [], scalar_prefetch = 0 : i64, scratch_operands = 0 : i64, tpu.core_type = #tpu.core_type<tc>} {
    %0 = tpu.iota {dimensions = array<i32: 0>} : vector<16x1xi32>
    %c8_i32 = arith.constant 8 : i32
    %1 = vector.broadcast %c8_i32 : i32 to vector<16x1xi32>
    %2 = arith.cmpi slt, %0, %1 : vector<16x1xi32>
    %c0 = arith.constant 0 : index
    %c0_0 = arith.constant 0 : index
    %3 = vector.load %arg0[%c0, %c0_0] : memref<16x128xbf16, #tpu.memory_space<vmem>>, vector<16x128xbf16>
    %c0_1 = arith.constant 0 : index
    %c0_2 = arith.constant 0 : index
    %4 = vector.load %arg3[%c0_1, %c0_2] : memref<2x256xf32, #tpu.memory_space<vmem>>, vector<1x128xf32>
    %c1 = arith.constant 1 : index
    %c0_3 = arith.constant 0 : index
    %5 = vector.load %arg3[%c1, %c0_3] : memref<2x256xf32, #tpu.memory_space<vmem>>, vector<1x128xf32>
    %c0_4 = arith.constant 0 : index
    %c0_5 = arith.constant 0 : index
    %6 = vector.load %arg1[%c0_4, %c0_5] : memref<128x128xbf16, #tpu.memory_space<vmem>>, vector<128x128xbf16>
    %cst = arith.constant dense<0.000000e+00> : vector<16x128xf32>
    %7 = tpu.matmul %3, %6, %cst {dimension_numbers = #tpu.dot_dimension_numbers<[1], [0], [0], [1], [0, 0, 1, 1], [], []>} : vector<16x128xbf16>, vector<128x128xbf16>, vector<16x128xf32> -> vector<16x128xf32>
    %cst_6 = arith.constant dense<0.000000e+00> : vector<128xf32>
    %8 = vector.multi_reduction <add>, %7, %cst_6 [0] : vector<16x128xf32> to vector<128xf32>
    %9 = vector.shape_cast %8 : vector<128xf32> to vector<1x128xf32>
    %cst_7 = arith.constant 1.250000e-01 : f32
    %10 = vector.broadcast %cst_7 : f32 to vector<1x128xf32>
    %11 = arith.mulf %9, %10 : vector<1x128xf32>
    %12 = arith.mulf %7, %7 : vector<16x128xf32>
    %cst_8 = arith.constant dense<0.000000e+00> : vector<128xf32>
    %13 = vector.multi_reduction <add>, %12, %cst_8 [0] : vector<16x128xf32> to vector<128xf32>
    %14 = vector.shape_cast %13 : vector<128xf32> to vector<1x128xf32>
    %cst_9 = arith.constant 1.250000e-01 : f32
    %15 = vector.broadcast %cst_9 : f32 to vector<1x128xf32>
    %16 = arith.mulf %14, %15 : vector<1x128xf32>
    %17 = arith.mulf %11, %11 : vector<1x128xf32>
    %18 = arith.subf %16, %17 : vector<1x128xf32>
    %cst_10 = arith.constant 0.000000e+00 : f32
    %19 = vector.broadcast %cst_10 : f32 to vector<1x128xf32>
    %20 = arith.maximumf %18, %19 : vector<1x128xf32>
    %cst_11 = arith.constant 9.99999974E-6 : f32
    %21 = vector.broadcast %cst_11 : f32 to vector<1x128xf32>
    %22 = arith.addf %20, %21 : vector<1x128xf32>
    %23 = math.rsqrt %22 : vector<1x128xf32>
    %24 = arith.mulf %4, %23 : vector<1x128xf32>
    %25 = arith.mulf %24, %11 : vector<1x128xf32>
    %26 = arith.subf %5, %25 : vector<1x128xf32>
    %27 = vector.broadcast %24 : vector<1x128xf32> to vector<16x128xf32>
    %28 = arith.mulf %27, %7 : vector<16x128xf32>
    %29 = vector.broadcast %26 : vector<1x128xf32> to vector<16x128xf32>
    %30 = arith.addf %28, %29 : vector<16x128xf32>
    %cst_12 = arith.constant 0.000000e+00 : f32
    %31 = vector.broadcast %cst_12 : f32 to vector<16x128xf32>
    %32 = arith.maximumf %30, %31 : vector<16x128xf32>
    %cst_13 = arith.constant 0.000000e+00 : f32
    %33 = vector.shape_cast %2 : vector<16x1xi1> to vector<16x1xi1>
    %34 = vector.broadcast %33 : vector<16x1xi1> to vector<16x128xi1>
    %35 = vector.broadcast %cst_13 : f32 to vector<16x128xf32>
    %36 = arith.select %34, %32, %35 : vector<16x128xi1>, vector<16x128xf32>
    %37 = arith.truncf %36 : vector<16x128xf32> to vector<16x128xbf16>
    %c0_14 = arith.constant 0 : index
    %c128 = arith.constant 128 : index
    %38 = vector.load %arg3[%c0_14, %c128] : memref<2x256xf32, #tpu.memory_space<vmem>>, vector<1x128xf32>
    %c1_15 = arith.constant 1 : index
    %c128_16 = arith.constant 128 : index
    %39 = vector.load %arg3[%c1_15, %c128_16] : memref<2x256xf32, #tpu.memory_space<vmem>>, vector<1x128xf32>
    %c0_17 = arith.constant 0 : index
    %c0_18 = arith.constant 0 : index
    %40 = vector.load %arg2[%c0_17, %c0_18] : memref<128x128xbf16, #tpu.memory_space<vmem>>, vector<128x128xbf16>
    %cst_19 = arith.constant dense<0.000000e+00> : vector<16x128xf32>
    %41 = tpu.matmul %37, %40, %cst_19 {dimension_numbers = #tpu.dot_dimension_numbers<[1], [0], [0], [1], [0, 0, 1, 1], [], []>} : vector<16x128xbf16>, vector<128x128xbf16>, vector<16x128xf32> -> vector<16x128xf32>
    %cst_20 = arith.constant dense<0.000000e+00> : vector<128xf32>
    %42 = vector.multi_reduction <add>, %41, %cst_20 [0] : vector<16x128xf32> to vector<128xf32>
    %43 = vector.shape_cast %42 : vector<128xf32> to vector<1x128xf32>
    %cst_21 = arith.constant 1.250000e-01 : f32
    %44 = vector.broadcast %cst_21 : f32 to vector<1x128xf32>
    %45 = arith.mulf %43, %44 : vector<1x128xf32>
    %46 = arith.mulf %41, %41 : vector<16x128xf32>
    %cst_22 = arith.constant dense<0.000000e+00> : vector<128xf32>
    %47 = vector.multi_reduction <add>, %46, %cst_22 [0] : vector<16x128xf32> to vector<128xf32>
    %48 = vector.shape_cast %47 : vector<128xf32> to vector<1x128xf32>
    %cst_23 = arith.constant 1.250000e-01 : f32
    %49 = vector.broadcast %cst_23 : f32 to vector<1x128xf32>
    %50 = arith.mulf %48, %49 : vector<1x128xf32>
    %51 = arith.mulf %45, %45 : vector<1x128xf32>
    %52 = arith.subf %50, %51 : vector<1x128xf32>
    %cst_24 = arith.constant 0.000000e+00 : f32
    %53 = vector.broadcast %cst_24 : f32 to vector<1x128xf32>
    %54 = arith.maximumf %52, %53 : vector<1x128xf32>
    %cst_25 = arith.constant 9.99999974E-6 : f32
    %55 = vector.broadcast %cst_25 : f32 to vector<1x128xf32>
    %56 = arith.addf %54, %55 : vector<1x128xf32>
    %57 = math.rsqrt %56 : vector<1x128xf32>
    %58 = arith.mulf %38, %57 : vector<1x128xf32>
    %59 = arith.mulf %58, %45 : vector<1x128xf32>
    %60 = arith.subf %39, %59 : vector<1x128xf32>
    %61 = vector.broadcast %58 : vector<1x128xf32> to vector<16x128xf32>
    %62 = arith.mulf %61, %41 : vector<16x128xf32>
    %63 = vector.broadcast %60 : vector<1x128xf32> to vector<16x128xf32>
    %64 = arith.addf %62, %63 : vector<16x128xf32>
    %cst_26 = arith.constant 0.000000e+00 : f32
    %65 = vector.broadcast %cst_26 : f32 to vector<16x128xf32>
    %66 = arith.maximumf %64, %65 : vector<16x128xf32>
    %cst_27 = arith.constant 0.000000e+00 : f32
    %67 = vector.shape_cast %2 : vector<16x1xi1> to vector<16x1xi1>
    %68 = vector.broadcast %67 : vector<16x1xi1> to vector<16x128xi1>
    %69 = vector.broadcast %cst_27 : f32 to vector<16x128xf32>
    %70 = arith.select %68, %66, %69 : vector<16x128xi1>, vector<16x128xf32>
    %71 = arith.truncf %70 : vector<16x128xf32> to vector<16x128xbf16>
    %72 = arith.extf %71 : vector<16x128xbf16> to vector<16x128xf32>
    %c0_28 = arith.constant 0 : index
    %c0_29 = arith.constant 0 : index
    %73 = vector.load %arg4[%c0_28, %c0_29] : memref<1x128xf32, #tpu.memory_space<vmem>>, vector<1x128xf32>
    %74 = vector.broadcast %73 : vector<1x128xf32> to vector<16x128xf32>
    %75 = arith.mulf %72, %74 : vector<16x128xf32>
    %cst_30 = arith.constant dense<0.000000e+00> : vector<16xf32>
    %76 = vector.multi_reduction <add>, %75, %cst_30 [1] : vector<16x128xf32> to vector<16xf32>
    %77 = vector.shape_cast %76 : vector<16xf32> to vector<16x1xf32>
    %c0_31 = arith.constant 0 : index
    %c0_32 = arith.constant 0 : index
    %78 = memref.load %arg5[%c0_31, %c0_32] : memref<1x1xf32, #tpu.memory_space<smem>>
    %79 = vector.broadcast %78 : f32 to vector<16x1xf32>
    %80 = arith.addf %77, %79 : vector<16x1xf32>
    %c0_33 = arith.constant 0 : index
    %c0_34 = arith.constant 0 : index
    %81 = vector.load %arg6[%c0_33, %c0_34] : memref<16x1xf32, #tpu.memory_space<vmem>>, vector<16x1xf32>
    tpu.vector_store %arg6[%c0_33, %c0_34], %80 {strides = array<i32>} : memref<16x1xf32, #tpu.memory_space<vmem>>, vector<16x1xf32>,
    return
  }
}

</mosaic_0001>

<bundles_post_ra>
// kernel: tpu_custom_call.1
= control target key start
LH: loop header
LB: loop body
LE: loop exit
PB: predicated region body
PF: predicated region fallthrough
CT: control target
= control target key end

     0   :  { %12 = vsyncpa [#allocation4], 0  ;;  %s674_s0 = inlined_call_operand.hbm [shape: bf16[16,128], index: 0, kind: input, shape index: {}]   ;;  %s675_s1 = inlined_call_operand.hbm [shape: bf16[128,128], index: 1, kind: input, shape index: {}]   ;;  %s676_s2 = inlined_call_operand.hbm [shape: bf16[128,128], index: 2, kind: input, shape index: {}]   ;;  %s677_s3 = inlined_call_operand.vmem [shape: f32[2,256], index: 3, kind: input, shape index: {}]   ;;  %s678_s4 = inlined_call_operand.vmem [shape: f32[1,128], index: 4, kind: input, shape index: {}]   ;;  %s679_s5 = inlined_call_operand.<no memory space> [shape: f32[1,1], index: 5, kind: input, shape index: {}]   ;;  %s680_s6 = inlined_call_operand.vmem [shape: f32[16,1], index: 6, kind: output, shape index: {}]  }
   0x1   :  { %13 = vsyncpa [#allocation6], 0  ;;  %s579_s21 = smov [#allocation5]   ;;  %s580_s23 = smov [#allocation3]  }
   0x2   :  { %s31_s22 = sshll.u32 %s579_s21, 4  ;;  %s19_s24 = sshll.u32 %s580_s23, 4  ;;  %s32_s22 = int_to_ptr.vmem [resolvable:$true] %s31_s22  ;;  %s20_s24 = int_to_ptr.vmem [resolvable:$true] %s19_s24 }
   0x3   :  { %s523_s25 = scalar_lea.vmem %s32_s22, 1024  ;;  %p528_p1 = scmp.lt.s32.totalorder %s32_s22, %s32_s22 }
   0x4   :  { %p524_p0 = scmp.ne.s32.totalorder %s32_s22, %s523_s25  ;;  %p529_p2 = scmp.lt.s32.totalorder %s523_s25, %s523_s25 }
   0x6   :  { %p530_p3 = por %p529_p2, %p528_p1 }
   0x8   :  { %p531_p4 = pnand %p530_p3, %p524_p0 }
   0xa   :  { %534 = shalt.err (!%p531_p4)
}
   0xb   :  { %s581_s26 = smov 64   ;;  %s582_s27 = smov 4  }
   0xc   :  { %37 = dma.hbm_to_vmem [thread:$0]  %s675_s1, 1024, %s32_s22, [#allocation6], %s581_s26, %s581_s26, %s582_s27  }
   0xd   :  { %s543_s30 = scalar_lea.vmem %s20_s24, 128  ;;  %p548_p6 = scmp.lt.s32.totalorder %s20_s24, %s20_s24 }
   0xe   :  { %p544_p5 = scmp.ne.s32.totalorder %s20_s24, %s543_s30  ;;  %p549_p7 = scmp.lt.s32.totalorder %s543_s30, %s543_s30 }
  0x10   :  { %p550_p8 = por %p549_p7, %p548_p6 }
  0x12   :  { %p551_p9 = pnand %p550_p8, %p544_p5 }
  0x14   :  { %554 = shalt.err (!%p551_p9)
}
  0x15   :  { %25 = dma.hbm_to_vmem [thread:$0]  %s674_s0, 128, %s20_s24, [#allocation4], %s581_s26, %s581_s26, %s582_s27  }
  0x16   :  { %s583_s9 = smov [#allocation7]  }
  0x17   :  { %s43_s10 = sshll.u32 %s583_s9, 4  ;;  %s44_s10 = int_to_ptr.vmem [resolvable:$true] %s43_s10 }
  0x18   :  { %s563_s11 = scalar_lea.vmem %s44_s10, 1024  ;;  %p568_p11 = scmp.lt.s32.totalorder %s44_s10, %s44_s10 }
  0x19   :  { %p564_p10 = scmp.ne.s32.totalorder %s44_s10, %s563_s11  ;;  %p569_p12 = scmp.lt.s32.totalorder %s563_s11, %s563_s11 }
  0x1b   :  { %p570_p13 = por %p569_p12, %p568_p11 }
  0x1d   :  { %p571_p0 = pnand %p570_p13, %p564_p10 }
  0x1f   :  { %574 = shalt.err (!%p571_p0)
}
  0x20   :  { %49 = dma.hbm_to_vmem [thread:$0]  %s676_s2, 1024, %s44_s10, [#allocation6], %s581_s26, %s581_s26, %s582_s27  }
  0x21   :  { %575 = dma.done.wait [#allocation4], 128  }
  0x22   :  { %576 = vsyncadd [#allocation4], 4294967168 }
  0x23   :  { %577 = dma.done.wait [#allocation6], 2048  }
  0x24   :  { %578 = vsyncadd [#allocation6], 4294965248  ;;  %v584_v0 = vmov 0.0   ;;  %vm585_vm0 = vmmov 0   ;;  %v494_v1 = vld [vmem:[#allocation5 + $0x38] sm:$0xff]   ;;  %v495_v2 = vld [vmem:[#allocation5 + $0x30] sm:$0xff]   ;;  %v212_v44 = vlaneseq }
  0x25   :  { %447 = vmatprep.subr.bf16.mxu0 %v584_v0  ;;  %463 = vmatprep.mubr.msk.bf16.mxu0 %vm585_vm0, %v584_v0  ;;  %v496_v3 = vld [vmem:[#allocation5 + $0x28] sm:$0xff]   ;;  %v497_v4 = vld [vmem:[#allocation5 + $0x20] sm:$0xff]   ;;  %v498_v5 = vld [vmem:[#allocation5 + $0x18] sm:$0xff]   ;;  %vm402_vm1 = vcmask 7168  }
  0x26   :  { %467 = vmatprep.subr.bf16.mxu1 %v584_v0  ;;  %483 = vmatprep.mubr.msk.bf16.mxu1 %vm585_vm0, %v584_v0  ;;  %v499_v6 = vld [vmem:[#allocation5 + $0x10] sm:$0xff]   ;;  %v500_v7 = vld [vmem:[#allocation5 + $0x8] sm:$0xff]   ;;  %v501_v8 = vld [vmem:[#allocation5] sm:$0xff]   ;;  %v213_v45 = vshrl.u32 %v212_v44, 7 }
  0x27   :  { %448 = vmatpush3.bf16.msra.mxu0 %v494_v1  ;;  %v502_v9 = vld [vmem:[#allocation3] sm:$0xff]   ;;  %v504_v11 = vld [vmem:[#allocation7 + $0x30] sm:$0xff]   ;;  %v505_v12 = vld [vmem:[#allocation7 + $0x28] sm:$0xff]  }
  0x28   :  { %449 = vmatprep.subr.bf16.mxu0 %v584_v0  ;;  %v503_v10 = vld [vmem:[#allocation7 + $0x38] sm:$0xff]   ;;  %v506_v13 = vld [vmem:[#allocation7 + $0x20] sm:$0xff]   ;;  %v508_v15 = vld [vmem:[#allocation7 + $0x10] sm:$0xff]   ;;  %v214_v47 = vsub.s32 0, %v213_v45 }
  0x29   :  { %468 = vmatpush3.bf16.msra.mxu1 %v503_v10  ;;  %v507_v14 = vld [vmem:[#allocation7 + $0x18] sm:$0xff]   ;;  %v509_v16 = vld [vmem:[#allocation7 + $0x8] sm:$0xff]   ;;  %v510_v17 = vld [vmem:[#allocation7] sm:$0xff]  }
  0x2a   :  { %469 = vmatprep.subr.bf16.mxu1 %v584_v0  ;;  %v73_v46 = vld [vmem:[%s677_s3] sm:$0x1]  ;;  %v74_v50 = vld [vmem:[%s677_s3 + $0x1] sm:$0x1] }
  0x2b   :  { %450 = vmatpush3.bf16.msra.mxu0 %v495_v2 }
  0x2c   :  { %451 = vmatprep.subr.bf16.mxu0 %v584_v0 }
  0x2d   :  { %470 = vmatpush3.bf16.msra.mxu1 %v504_v11 }
  0x2e   :  { %471 = vmatprep.subr.bf16.mxu1 %v584_v0 }
  0x2f   :  { %452 = vmatpush3.bf16.msra.mxu0 %v496_v3 }
  0x30   :  { %453 = vmatprep.subr.bf16.mxu0 %v584_v0 }
  0x31   :  { %472 = vmatpush3.bf16.msra.mxu1 %v505_v12 }
  0x32   :  { %473 = vmatprep.subr.bf16.mxu1 %v584_v0 }
  0x33   :  { %454 = vmatpush3.bf16.msra.mxu0 %v497_v4 }
  0x34   :  { %455 = vmatprep.subr.bf16.mxu0 %v584_v0 }
  0x35   :  { %474 = vmatpush3.bf16.msra.mxu1 %v506_v13 }
  0x36   :  { %475 = vmatprep.subr.bf16.mxu1 %v584_v0 }
  0x37   :  { %456 = vmatpush3.bf16.msra.mxu0 %v498_v5 }
  0x38   :  { %457 = vmatprep.subr.bf16.mxu0 %v584_v0 }
  0x39   :  { %476 = vmatpush3.bf16.msra.mxu1 %v507_v14 }
  0x3a   :  { %477 = vmatprep.subr.bf16.mxu1 %v584_v0 }
  0x3b   :  { %458 = vmatpush3.bf16.msra.mxu0 %v499_v6 }
  0x3c   :  { %459 = vmatprep.subr.bf16.mxu0 %v584_v0 }
  0x3d   :  { %478 = vmatpush3.bf16.msra.mxu1 %v508_v15 }
  0x3e   :  { %479 = vmatprep.subr.bf16.mxu1 %v584_v0 }
  0x3f   :  { %460 = vmatpush3.bf16.msra.mxu0 %v500_v7 }
  0x40   :  { %461 = vmatprep.subr.bf16.mxu0 %v584_v0 }
  0x41   :  { %480 = vmatpush3.bf16.msra.mxu1 %v509_v16 }
  0x42   :  { %481 = vmatprep.subr.bf16.mxu1 %v584_v0 }
  0x43   :  { %462 = vmatpush3.bf16.msra.mxu0 %v501_v8 }
  0x45   :  { %482 = vmatpush3.bf16.msra.mxu1 %v510_v17 }
  0x46   :  { %464 = vmatmul.mubr.bf16.vlgmr.msra.gmra.mxu0 %v502_v9 }
 0x106   :  { %v179_v18 = vpop.f32.mrf.mxu0 }
 0x107   :  { %v194_v21 = vmul.f32 %v179_v18, %v179_v18 }
 0x108   :  { %v465_v19 = vpop.f32.mrf.mxu0 }
 0x10a   :  { %v182_v20 = vpop.f32.mrf.mxu0 }
 0x10b   :  { %v186_v22 = vadd.f32 %v182_v20, %v179_v18  ;;  %v195_v23 = vmul.f32 %v182_v20, %v182_v20 }
 0x10c   :  { %v466_v24 = vpop.f32.mrf.mxu0 }
 0x10d   :  { %v187_v25 = vrot.slane %v186_v22, 4  ;;  %v196_v26 = vadd.f32 %v195_v23, %v194_v21 }
 0x10f   :  { %v188_v27 = vadd.f32 %v187_v25, %v186_v22  ;;  %v197_v28 = vrot.slane %v196_v26, 4  ;;  %v233_v22 = vld [vmem:[%s677_s3 + $0x2] sm:$0x1]  ;;  %v234_v25 = vld [vmem:[%s677_s3 + $0x3] sm:$0x1] }
 0x111   :  { %v189_v29 = vrot.slane %v188_v27, 2  ;;  %v198_v30 = vadd.f32 %v197_v28, %v196_v26 }
 0x113   :  { %v190_v31 = vadd.f32 %v189_v29, %v188_v27  ;;  %v199_v32 = vrot.slane %v198_v30, 2 }
 0x115   :  { %v191_v33 = vrot.slane %v190_v31, 1  ;;  %v200_v34 = vadd.f32 %v199_v32, %v198_v30 }
 0x117   :  { %v192_v35 = vadd.f32 %v191_v33, %v190_v31  ;;  %v201_v36 = vrot.slane %v200_v34, 1 }
 0x119   :  { %v193_v37 = vmul.f32 0.125, %v192_v35  ;;  %v202_v38 = vadd.f32 %v201_v36, %v200_v34  ;;  %v428_v34 = vld [vmem:[%s678_s4] ss:$0 sm:$0xff] }
 0x11b   :  { %v203_v39 = vmul.f32 0.125, %v202_v38  ;;  %v204_v40 = vmul.f32 %v193_v37, %v193_v37  ;;  %v399_v38 = vstv %s679_s5 }
 0x11d   :  { %v205_v41 = vsub.f32 %v203_v39, %v204_v40 }
 0x11f   :  { %v206_v42 = vmax.f32 %v205_v41, 0.0 }
 0x121   :  { %v207_v43 = vadd.f32 1e-05, %v206_v42 }
 0x123   :  { %511 = vrsqrt.f32 %v207_v43 }
 0x130   :  { %v512_v48 = vpop.eup %511 }
 0x131   :  { %v209_v49 = vmul.f32 %v512_v48, %v73_v46 }
 0x133   :  { %v210_v51 = vmul.f32 %v209_v49, %v193_v37  ;;  %v215_v52 = vrot.slane %v209_v49, %v214_v47  ;;  %v393_v37 = vmul.f32 0.0, %v428_v34 }
 0x135   :  { %v211_v53 = vsub.f32 %v74_v50, %v210_v51  ;;  %v216_v54 = vmul.f32 %v215_v52, %v179_v18 }
 0x137   :  { %v221_v55 = vrot.slane %v211_v53, %v214_v47 }
 0x139   :  { %v222_v56 = vadd.f32 %v221_v55, %v216_v54 }
 0x13b   :  { %v224_v57 = vmax.f32 %v222_v56, 0.0 }
 0x13d   :  { %v232_v58 = vpack.c.bf16 %v584_v0, %v224_v57 }
 0x13f   :  { %484 = vmatmul.mubr.bf16.vlgmr.msra.gmra.mxu1 %v232_v58 }
 0x1ff   :  { %v333_v59 = vpop.f32.mrf.mxu1 }
 0x200   :  { %v348_v62 = vmul.f32 %v333_v59, %v333_v59 }
 0x201   :  { %v485_v60 = vpop.f32.mrf.mxu1 }
 0x203   :  { %v336_v61 = vpop.f32.mrf.mxu1 }
 0x204   :  { %v340_v63 = vadd.f32 %v336_v61, %v333_v59  ;;  %v349_v1 = vmul.f32 %v336_v61, %v336_v61 }
 0x205   :  { %v486_v2 = vpop.f32.mrf.mxu1 }
 0x206   :  { %v341_v3 = vrot.slane %v340_v63, 4  ;;  %v350_v4 = vadd.f32 %v349_v1, %v348_v62 }
 0x208   :  { %v342_v5 = vadd.f32 %v341_v3, %v340_v63  ;;  %v351_v6 = vrot.slane %v350_v4, 4 }
 0x20a   :  { %v343_v7 = vrot.slane %v342_v5, 2  ;;  %v352_v8 = vadd.f32 %v351_v6, %v350_v4 }
 0x20c   :  { %v344_v9 = vadd.f32 %v343_v7, %v342_v5  ;;  %v353_v10 = vrot.slane %v352_v8, 2 }
 0x20e   :  { %v345_v11 = vrot.slane %v344_v9, 1  ;;  %v354_v12 = vadd.f32 %v353_v10, %v352_v8 }
 0x210   :  { %v346_v13 = vadd.f32 %v345_v11, %v344_v9  ;;  %v355_v14 = vrot.slane %v354_v12, 1 }
 0x212   :  { %v347_v15 = vmul.f32 0.125, %v346_v13  ;;  %v356_v16 = vadd.f32 %v355_v14, %v354_v12 }
 0x214   :  { %v357_v17 = vmul.f32 0.125, %v356_v16  ;;  %v358_v18 = vmul.f32 %v347_v15, %v347_v15 }
 0x216   :  { %v359_v19 = vsub.f32 %v357_v17, %v358_v18 }
 0x218   :  { %v360_v20 = vmax.f32 %v359_v19, 0.0 }
 0x21a   :  { %v361_v21 = vadd.f32 1e-05, %v360_v20 }
 0x21c   :  { %513 = vrsqrt.f32 %v361_v21 }
 0x229   :  { %v514_v23 = vpop.eup %513 }
 0x22a   :  { %v363_v24 = vmul.f32 %v514_v23, %v233_v22 }
 0x22c   :  { %v364_v26 = vmul.f32 %v363_v24, %v347_v15  ;;  %v369_v27 = vrot.slane %v363_v24, %v214_v47 }
 0x22e   :  { %v365_v28 = vsub.f32 %v234_v25, %v364_v26  ;;  %v370_v29 = vmul.f32 %v369_v27, %v333_v59 }
 0x230   :  { %v375_v30 = vrot.slane %v365_v28, %v214_v47 }
 0x232   :  { %v376_v31 = vadd.f32 %v375_v30, %v370_v29 }
 0x234   :  { %v378_v32 = vmax.f32 %v376_v31, 0.0 }
 0x236   :  { %v382_v33 = vpack.c.bf16 %v584_v0, %v378_v32 }
 0x238   :  { %v383_v35 = vunpack.c.l.bf16 %v382_v33 }
 0x23a   :  { %v392_v36 = vmul.f32 %v428_v34, %v383_v35 }
 0x23c   :  { %394 = vadd.xlane.f32.xlu0 %v392_v36 }
 0x240   :  { %396 = vadd.xlane.f32.xlu0 %v393_v37 }
 0x2c5   :  { %v395_v39 = vpop.xlane.xlu0 %394 }
 0x2c6   :  { %v400_v40 = vadd.f32 %v399_v38, %v395_v39 }
 0x2c8   :  { %403 = vst.msk [vmem:[%s680_s6] sm:$0xff] %vm402_vm1, %v400_v40 }
 0x2c9   :  { %v397_v0 = vpop.xlane.xlu0 %396 }
 0x2ca   :  { %v401_v41 = vadd.f32 %v399_v38, %v397_v0 }
 0x2cc   :  { %404 = vst.msk [vmem:[%s680_s6 + $0x8] sm:$0xff] %vm402_vm1, %v401_v41 }
 0x2cd   :  { %409 = vsyncpa [#allocation4], 1 }
 0x2ce   :  { %410 = vsyncpa [#allocation6], 1 }

</bundles_post_ra>
